<compile_context>
chip_gen: v7x
topology: tpu7x:2x2x1
jax: 0.10.0
libtpu: 0.0.40
codegen_flags: <defaults>
</compile_context>

<pallas_src>
import functools
import math

import jax
import jax.numpy as jnp
from jax.experimental import pallas as pl
from jax.experimental.pallas import tpu as pltpu


_GELU_C = math.sqrt(2.0 / math.pi)


def _round_up(v, m):
    return ((v + m - 1) // m) * m


def _gelu_tanh_f32(z):
    # tanh-approximate GELU in f32 (tanh -> EUP slot; mul/add -> VPU).
    return 0.5 * z * (1.0 + jnp.tanh(_GELU_C * (z + 0.044715 * (z * z * z))))


def _fused_kernel(x_ref, w_ref, *refs, has_bias, acc_in_out):
    """Computes one (tm, tn) output tile; K is the innermost 'arbitrary' axis."""
    if has_bias:
        b_ref, *refs = refs
    o_ref, *refs = refs
    acc_ref = o_ref if acc_in_out else refs[0]

    k = pl.program_id(2)
    part = jnp.dot(x_ref[...], w_ref[...], preferred_element_type=jnp.float32)

    @pl.when(k == 0)
    def _():                       # first K step: write, don't zero + add
        acc_ref[...] = part

    @pl.when(k != 0)
    def _():
        acc_ref[...] += part

    @pl.when(k == pl.num_programs(2) - 1)
    def _():
        z = acc_ref[...]
        if has_bias:
            z = z + b_ref[...]     # (1, tn) f32, broadcasts over sublanes
        o_ref[...] = _gelu_tanh_f32(z).astype(o_ref.dtype)


def _pick_tile(dim, cap, *, align=128, floor=256, full_cap=None):
    """Pick a tile (multiple of `align`, <= cap) minimizing padding of `dim`."""
    full = _round_up(dim, align)
    if full <= (full_cap if full_cap is not None else cap):
        return full
    best_t, best_pad = cap, None
    t = cap
    while t >= floor:
        pad = _round_up(dim, t) - dim
        if best_pad is None or pad < best_pad:
            best_t, best_pad = t, pad
        t -= align
    return best_t


def _tpu_vmem_capacity_bytes():
    try:
        return int(pltpu.get_tpu_info().vmem_capacity_bytes)
    except Exception:
        return 64 << 20            # conservative (v7x-sized) fallback


@functools.partial(jax.jit, static_argnames=("tm", "tn", "tk", "use_bf16"))
def linear_gelu(x, weight, bias=None, *, tm=None, tn=None, tk=None, use_bf16=True):
    """Fused Linear + tanh-GELU on TPU via Pallas.

    x:      (..., in_features)
    weight: (out_features, in_features)   -- PyTorch nn.Linear convention
    bias:   (out_features,) or None
    returns (..., out_features), dtype == x.dtype

    Note: use_bf16=True casts x/W to bf16 for the MXU (f32 accumulation/epilogue);
    error vs. the f32 PyTorch path grows ~sqrt(K). Pass use_bf16=False for full f32.
    """
    in_features = x.shape[-1]
    out_features = weight.shape[0]
    lead_shape = x.shape[:-1]
    out_dtype = x.dtype

    x2d = x.reshape(-1, in_features)       # (M, K)
    M, K = x2d.shape
    N = out_features

    # ---- generation-aware tile selection ------------------------------------
    vmem_cap = _tpu_vmem_capacity_bytes()
    # 128 MiB VMEM (v5e/v6e): big output tiles (v6e HBM ridge ~680 FLOP/byte);
    # 64 MiB VMEM (v7x): 1024 tiles are already past its ~311 FLOP/byte ridge.
    par_cap = 1536 if vmem_cap >= (96 << 20) else 1024
    vmem_limit = int(min(64 << 20, max(32 << 20, vmem_cap // 2)))

    auto_tm, auto_tn = tm is None, tn is None
    if tm is None:
        m16 = _round_up(M, 16)             # bf16 sublane-pack minimum (also /8 f32)
        tm = m16 if m16 <= par_cap else _pick_tile(M, par_cap)
    if tn is None:
        tn = _pick_tile(N, par_cap)        # lane-dense (128-aligned) output
    if tk is None:
        tk = _pick_tile(K, 512, full_cap=1024)   # minimize K padding, small per-step VMEM

    Mp, Np, Kp = _round_up(M, tm), _round_up(N, tn), _round_up(K, tk)
    gm, gn, gk = Mp // tm, Np // tn, Kp // tk

    # Megacore guard: a 1x1 parallel grid leaves one v7x TensorCore idle.
    if gm == 1 and gn == 1:
        if auto_tn and Np >= 256:
            tn = _round_up(Np // 2, 128)
            Np = _round_up(N, tn); gn = Np // tn
        elif auto_tm and Mp >= 256:
            tm = _round_up(Mp // 2, 16)
            Mp = _round_up(M, tm); gm = Mp // tm

    # ---- dtype / layout: bf16 MXU inputs, (K, N) weight, f32 bias -----------
    mxu_dtype = jnp.bfloat16 if use_bf16 else x2d.dtype
    x2d = x2d.astype(mxu_dtype)
    w2d = weight.T.astype(mxu_dtype)       # one-time (constant-folded for static weights)
    has_bias = bias is not None

    if (Mp, Kp) != (M, K):
        x2d = jnp.pad(x2d, ((0, Mp - M), (0, Kp - K)))
    if (Kp, Np) != (K, N):
        w2d = jnp.pad(w2d, ((0, Kp - K), (0, Np - N)))

    # Larger parallel extent first so both v7x TensorCores get work.
    if gn >= gm:
        grid = (gn, gm, gk)
        x_map = lambda j, i, k: (i, k)
        w_map = lambda j, i, k: (k, j)
        b_map = lambda j, i, k: (0, j)
        o_map = lambda j, i, k: (i, j)
    else:
        grid = (gm, gn, gk)
        x_map = lambda i, j, k: (i, k)
        w_map = lambda i, j, k: (k, j)
        b_map = lambda i, j, k: (0, j)
        o_map = lambda i, j, k: (i, j)

    operands = [x2d, w2d]
    in_specs = [
        pl.BlockSpec((tm, tk), x_map),     # x tile (M, K)
        pl.BlockSpec((tk, tn), w_map),     # weight tile (K, N): canonical MXU orientation
    ]
    if has_bias:
        b2d = bias.astype(jnp.float32).reshape(1, N)
        if Np != N:
            b2d = jnp.pad(b2d, ((0, 0), (0, Np - N)))
        operands.append(b2d)
        in_specs.append(pl.BlockSpec((1, tn), b_map))

    acc_in_out = (out_dtype == jnp.float32)
    scratch_shapes = [] if acc_in_out else [pltpu.VMEM((tm, tn), jnp.float32)]
    kernel = functools.partial(_fused_kernel, has_bias=has_bias, acc_in_out=acc_in_out)

    in_bytes = jnp.dtype(mxu_dtype).itemsize
    out_bytes = jnp.dtype(out_dtype).itemsize
    cost = pl.CostEstimate(
        flops=2 * Mp * Np * Kp,
        transcendentals=Mp * Np,                        # one tanh per output element
        bytes_accessed=(Mp * Kp * in_bytes * gn         # x re-streamed once per N tile
                        + Kp * Np * in_bytes * gm       # w re-streamed once per M tile
                        + (Np * 4 * gm * gn if has_bias else 0)
                        + Mp * Np * out_bytes),
    )

    out_padded = pl.pallas_call(
        kernel,
        out_shape=jax.ShapeDtypeStruct((Mp, Np), out_dtype),
        grid_spec=pltpu.PrefetchScalarGridSpec(
            num_scalar_prefetch=0,
            grid=grid,
            in_specs=in_specs,
            out_specs=pl.BlockSpec((tm, tn), o_map),
            scratch_shapes=scratch_shapes,
        ),
        compiler_params=pltpu.CompilerParams(
            dimension_semantics=("parallel", "parallel", "arbitrary"),
            vmem_limit_bytes=vmem_limit,
            allow_input_fusion=[True] * len(operands),  # fuse wrapper cast/pad producers
        ),
        cost_estimate=cost,
    )(*operands)

    out2d = out_padded[:M, :N]                          # drop padded rows/cols
    return out2d.reshape(*lead_shape, out_features)


# TODO(synk): tpp_linear_gelu / woq (weight-only-quant) fast paths from IPEX have no
# direct Pallas equivalent; the standard fp Linear+GELU math above matches the
# module's non-tpp forward semantics.

if __name__ == "__main__":
    # Shapes consistent with the module: x = (batch, seq, hidden), Linear(hidden -> out).
    batch, seq, hidden, out_feat = 2, 8, 32, 64

    key = jax.random.PRNGKey(0)
    kx, kw, kb = jax.random.split(key, 3)

    x = jax.random.normal(kx, (batch, seq, hidden), dtype=jnp.float32)
    weight = jax.random.normal(kw, (out_feat, hidden), dtype=jnp.float32) * 0.05
    bias = jax.random.normal(kb, (out_feat,), dtype=jnp.float32) * 0.05

    # Reference (plain JAX, f32): the PyTorch non-tpp forward — Linear + tanh-GELU.
    def ref_fn(xx, ww, bb):
        z = xx @ ww.T + (bb if bb is not None else 0.0)
        return 0.5 * z * (1.0 + jnp.tanh(math.sqrt(2.0 / math.pi)
                                         * (z + 0.044715 * z ** 3)))

    # With bias.
    y = jax.block_until_ready(linear_gelu(x, weight, bias))
    ref = ref_fn(x, weight, bias)
    assert y.shape == (batch, seq, out_feat)
    assert jnp.allclose(y, ref, atol=3e-2, rtol=3e-2), float(jnp.max(jnp.abs(y - ref)))

    # Without bias (specialized kernel path).
    y0 = jax.block_until_ready(linear_gelu(x, weight))
    ref0 = ref_fn(x, weight, None)
    assert jnp.allclose(y0, ref0, atol=3e-2, rtol=3e-2), float(jnp.max(jnp.abs(y0 - ref0)))

    print("KERNEL_OK")
</pallas_src>

<mosaic_0001>
module attributes {stable_mosaic.version = 11 : i64} {
  func.func @_fused_kernel(%arg0: i32, %arg1: i32, %arg2: i32, %arg3: memref<16x128xbf16, #tpu.memory_space<vmem>>, %arg4: memref<128x128xbf16, #tpu.memory_space<vmem>>, %arg5: memref<1x128xf32, #tpu.memory_space<vmem>>, %arg6: memref<16x128xf32, #tpu.memory_space<vmem>>) attributes {dimension_semantics = [#tpu.dimension_semantics<parallel>, #tpu.dimension_semantics<parallel>, #tpu.dimension_semantics<arbitrary>], iteration_bounds = array<i64: 1, 1, 1>, scalar_prefetch = 0 : i64, scratch_operands = 0 : i64, tpu.core_type = #tpu.core_type<tc>, window_params = [{transform_indices = @transform_0, window_bounds = array<i64: 16, 128>}, {transform_indices = @transform_1, window_bounds = array<i64: 128, 128>}, {transform_indices = @transform_2, window_bounds = array<i64: 1, 128>}, {transform_indices = @transform_3, window_bounds = array<i64: 16, 128>}]} {
    %c0 = arith.constant 0 : index
    %c0_0 = arith.constant 0 : index
    %0 = vector.load %arg3[%c0, %c0_0] : memref<16x128xbf16, #tpu.memory_space<vmem>>, vector<16x128xbf16>
    %c0_1 = arith.constant 0 : index
    %c0_2 = arith.constant 0 : index
    %1 = vector.load %arg4[%c0_1, %c0_2] : memref<128x128xbf16, #tpu.memory_space<vmem>>, vector<128x128xbf16>
    %cst = arith.constant dense<0.000000e+00> : vector<16x128xf32>
    %2 = tpu.matmul %0, %1, %cst {dimension_numbers = #tpu.dot_dimension_numbers<[1], [0], [0], [1], [0, 0, 1, 1], [], []>} : vector<16x128xbf16>, vector<128x128xbf16>, vector<16x128xf32> -> vector<16x128xf32>
    %c0_i32 = arith.constant 0 : i32
    %3 = arith.cmpi eq, %arg2, %c0_i32 : i32
    %4 = arith.extui %3 : i1 to i32
    %c0_i32_3 = arith.constant 0 : i32
    %5 = arith.cmpi ne, %4, %c0_i32_3 : i32
    scf.if %5 {
      %c0_8 = arith.constant 0 : index
      %c0_9 = arith.constant 0 : index
      %12 = vector.load %arg6[%c0_8, %c0_9] : memref<16x128xf32, #tpu.memory_space<vmem>>, vector<16x128xf32>
      tpu.vector_store %arg6[%c0_8, %c0_9], %2 {strides = array<i32>} : memref<16x128xf32, #tpu.memory_space<vmem>>, vector<16x128xf32>,
    } else {
    }
    %c0_i32_4 = arith.constant 0 : i32
    %6 = arith.cmpi ne, %arg2, %c0_i32_4 : i32
    %7 = arith.extui %6 : i1 to i32
    %c0_i32_5 = arith.constant 0 : i32
    %8 = arith.cmpi ne, %7, %c0_i32_5 : i32
    scf.if %8 {
      %c0_8 = arith.constant 0 : index
      %c0_9 = arith.constant 0 : index
      %12 = vector.load %arg6[%c0_8, %c0_9] : memref<16x128xf32, #tpu.memory_space<vmem>>, vector<16x128xf32>
      %13 = arith.addf %12, %2 : vector<16x128xf32>
      %c0_10 = arith.constant 0 : index
      %c0_11 = arith.constant 0 : index
      %14 = vector.load %arg6[%c0_10, %c0_11] : memref<16x128xf32, #tpu.memory_space<vmem>>, vector<16x128xf32>
      tpu.vector_store %arg6[%c0_10, %c0_11], %13 {strides = array<i32>} : memref<16x128xf32, #tpu.memory_space<vmem>>, vector<16x128xf32>,
    } else {
    }
    %c0_i32_6 = arith.constant 0 : i32
    %9 = arith.cmpi eq, %arg2, %c0_i32_6 : i32
    %10 = arith.extui %9 : i1 to i32
    %c0_i32_7 = arith.constant 0 : i32
    %11 = arith.cmpi ne, %10, %c0_i32_7 : i32
    scf.if %11 {
      %c0_8 = arith.constant 0 : index
      %c0_9 = arith.constant 0 : index
      %12 = vector.load %arg6[%c0_8, %c0_9] : memref<16x128xf32, #tpu.memory_space<vmem>>, vector<16x128xf32>
      %c0_10 = arith.constant 0 : index
      %c0_11 = arith.constant 0 : index
      %13 = vector.load %arg5[%c0_10, %c0_11] : memref<1x128xf32, #tpu.memory_space<vmem>>, vector<1x128xf32>
      %14 = vector.broadcast %13 : vector<1x128xf32> to vector<16x128xf32>
      %15 = arith.addf %12, %14 : vector<16x128xf32>
      %cst_12 = arith.constant 5.000000e-01 : f32
      %16 = vector.broadcast %cst_12 : f32 to vector<16x128xf32>
      %17 = arith.mulf %16, %15 : vector<16x128xf32>
      %18 = arith.mulf %15, %15 : vector<16x128xf32>
      %19 = arith.mulf %18, %15 : vector<16x128xf32>
      %cst_13 = arith.constant 4.471500e-02 : f32
      %20 = vector.broadcast %cst_13 : f32 to vector<16x128xf32>
      %21 = arith.mulf %20, %19 : vector<16x128xf32>
      %22 = arith.addf %15, %21 : vector<16x128xf32>
      %cst_14 = arith.constant 0.797884583 : f32
      %23 = vector.broadcast %cst_14 : f32 to vector<16x128xf32>
      %24 = arith.mulf %23, %22 : vector<16x128xf32>
      %25 = math.tanh %24 : vector<16x128xf32>
      %cst_15 = arith.constant 1.000000e+00 : f32
      %26 = vector.broadcast %cst_15 : f32 to vector<16x128xf32>
      %27 = arith.addf %26, %25 : vector<16x128xf32>
      %28 = arith.mulf %17, %27 : vector<16x128xf32>
      %c0_16 = arith.constant 0 : index
      %c0_17 = arith.constant 0 : index
      %29 = vector.load %arg6[%c0_16, %c0_17] : memref<16x128xf32, #tpu.memory_space<vmem>>, vector<16x128xf32>
      tpu.vector_store %arg6[%c0_16, %c0_17], %28 {strides = array<i32>} : memref<16x128xf32, #tpu.memory_space<vmem>>, vector<16x128xf32>,
    } else {
    }
    return
  }
  func.func @transform_0(%arg0: i32, %arg1: i32, %arg2: i32) -> (i32, i32) {
    %c0_i32 = arith.constant 0 : i32
    return %arg1, %arg2 : i32, i32
  }
  func.func @transform_1(%arg0: i32, %arg1: i32, %arg2: i32) -> (i32, i32) {
    %c0_i32 = arith.constant 0 : i32
    return %arg2, %arg0 : i32, i32
  }
  func.func @transform_2(%arg0: i32, %arg1: i32, %arg2: i32) -> (i32, i32) {
    %c0_i32 = arith.constant 0 : i32
    %c0_i32_0 = arith.constant 0 : i32
    return %c0_i32, %arg0 : i32, i32
  }
  func.func @transform_3(%arg0: i32, %arg1: i32, %arg2: i32) -> (i32, i32) {
    %c0_i32 = arith.constant 0 : i32
    return %arg1, %arg0 : i32, i32
  }
}

</mosaic_0001>

<bundles_post_ra>
// kernel: linear_gelu.2
= control target key start
LH: loop header
LB: loop body
LE: loop exit
PB: predicated region body
PF: predicated region fallthrough
CT: control target
= control target key end

     0   :  { %s574_s0 = inlined_call_operand.vmem [shape: bf16[32,64], index: 0, kind: input, shape index: {}]   ;;  %s575_s1 = inlined_call_operand.<no memory space> [shape: bf16[], index: 1, kind: input, shape index: {}]   ;;  %s576_s2 = inlined_call_operand.vmem [shape: bf16[16,32], index: 2, kind: input, shape index: {}]   ;;  %s577_s3 = inlined_call_operand.vmem [shape: f32[1,64], index: 3, kind: input, shape index: {}]   ;;  %s578_s4 = inlined_call_operand.<no memory space> [shape: f32[], index: 4, kind: input, shape index: {}]   ;;  %s579_s5 = inlined_call_operand.vmem [shape: f32[16,128], index: 5, kind: output, shape index: {}]  }
   0x1   :  { %v10_v0 = vstv %s575_s1  ;;  %v20_v1 = vstv %s578_s4 }
   0x2   :  { %v11_v2 = vunpack.i.l.bf16 %v10_v0 }
   0x3   :  { %v39_v3 = vlaneseq  ;;  %v78_v4 = vld [vmem:[%s574_s0] sm:$0xff]   ;;  %v396_v5 = vld [vmem:[%s574_s0 + $0x8] sm:$0xff]   ;;  %v482_v8 = vmov 0.0   ;;  %vm483_vm0 = vmmov 0  }
   0x4   :  { %v411_v6 = vpack.c.bf16 %v11_v2, %v11_v2  ;;  %v36_v7 = vld [vmem:[%s576_s2] sm:$0xff]   ;;  %447 = vmatprep.subr.bf16.mxu0 %v482_v8  ;;  %v79_v9 = vunpack.c.l.bf16 %v78_v4  ;;  %v100_v10 = vunpack.c.h.bf16 %v78_v4  ;;  %v122_v11 = vunpack.c.l.bf16 %v396_v5  ;;  %463 = vmatprep.mubr.msk.bf16.mxu0 %vm483_vm0, %v482_v8 }
   0x5   :  { %v144_v12 = vunpack.c.h.bf16 %v396_v5  ;;  %v530_v13 = vand.u32 127, %v39_v3  ;;  %v37_v14 = vunpack.c.l.bf16 %v36_v7  ;;  %v58_v15 = vunpack.c.h.bf16 %v36_v7 }
   0x6   :  { %412 = vst [vmem:[#allocation18 + $0x10] sm:$0xff] %v411_v6   ;;  %417 = vst [vmem:[#allocation18 + $0x18] sm:$0xff] %v411_v6  }
   0x7   :  { %422 = vst [vmem:[#allocation18 + $0x20] sm:$0xff] %v411_v6   ;;  %427 = vst [vmem:[#allocation18 + $0x28] sm:$0xff] %v411_v6   ;;  %vm84_vm1 = vcmp.lt.s32.totalorder %v530_v13, 64  ;;  %vm42_vm2 = vcmp.lt.s32.totalorder %v530_v13, 32 }
   0x8   :  { %432 = vst [vmem:[#allocation18 + $0x30] sm:$0xff] %v411_v6   ;;  %437 = vst [vmem:[#allocation18 + $0x38] sm:$0xff] %v411_v6   ;;  %v85_v16 = vsel %vm84_vm1, %v79_v9, %v11_v2  ;;  %v106_v17 = vsel %vm84_vm1, %v100_v10, %v11_v2  ;;  %v128_v18 = vsel %vm84_vm1, %v122_v11, %v11_v2 }
   0x9   :  { %v150_v19 = vsel %vm84_vm1, %v144_v12, %v11_v2  ;;  %v86_v20 = vpack.c.bf16 %v482_v8, %v85_v16  ;;  %v108_v21 = vpack.c.bf16 %v482_v8, %v106_v17  ;;  %v130_v22 = vpack.c.bf16 %v482_v8, %v128_v18 }
   0xa   :  { %v152_v23 = vpack.c.bf16 %v482_v8, %v150_v19  ;;  %v43_v24 = vsel %vm42_vm2, %v37_v14, %v11_v2  ;;  %v64_v25 = vsel %vm42_vm2, %v58_v15, %v11_v2 }
   0xb   :  { %88 = vst [vmem:[#allocation18] sm:$0xf] %v86_v20  ;;  %110 = vst [vmem:[#allocation18 + $0x4] sm:$0xf] %v108_v21  ;;  %v44_v26 = vpack.c.bf16 %v482_v8, %v43_v24  ;;  %v66_v27 = vpack.c.bf16 %v482_v8, %v64_v25 }
   0xc   :  { %132 = vst [vmem:[#allocation18 + $0x8] sm:$0xf] %v130_v22  ;;  %154 = vst [vmem:[#allocation18 + $0xc] sm:$0xf] %v152_v23 }
   0xd   :  { %46 = vst [vmem:[#allocation17] sm:$0xf] %v44_v26  ;;  %68 = vst [vmem:[#allocation17 + $0x4] sm:$0xf] %v66_v27  ;;  %v471_v30 = vld [vmem:[#allocation18 + $0x10] sm:$0xff]   ;;  %v472_v31 = vld [vmem:[#allocation18 + $0x18] sm:$0xff]  }
   0xe   :  { %v473_v32 = vld [vmem:[#allocation18 + $0x20] sm:$0xff]   ;;  %v474_v33 = vld [vmem:[#allocation18 + $0x28] sm:$0xff]  }
   0xf   :  { %v475_v34 = vld [vmem:[#allocation18 + $0x30] sm:$0xff]   ;;  %v476_v35 = vld [vmem:[#allocation18 + $0x38] sm:$0xff]  }
  0x12   :  { %v469_v28 = vld [vmem:[#allocation18] sm:$0xff]  }
  0x13   :  { %448 = vmatpush3.bf16.msra.mxu0 %v469_v28  ;;  %v470_v29 = vld [vmem:[#allocation18 + $0x8] sm:$0xff]  }
  0x14   :  { %449 = vmatprep.subr.bf16.mxu0 %v482_v8  ;;  %v477_v36 = vld [vmem:[#allocation17] sm:$0xff]  }
  0x17   :  { %450 = vmatpush3.bf16.msra.mxu0 %v470_v29 }
  0x18   :  { %451 = vmatprep.subr.bf16.mxu0 %v482_v8 }
  0x1b   :  { %452 = vmatpush3.bf16.msra.mxu0 %v471_v30 }
  0x1c   :  { %453 = vmatprep.subr.bf16.mxu0 %v482_v8 }
  0x1f   :  { %454 = vmatpush3.bf16.msra.mxu0 %v472_v31 }
  0x20   :  { %455 = vmatprep.subr.bf16.mxu0 %v482_v8 }
  0x23   :  { %456 = vmatpush3.bf16.msra.mxu0 %v473_v32 }
  0x24   :  { %457 = vmatprep.subr.bf16.mxu0 %v482_v8 }
  0x27   :  { %458 = vmatpush3.bf16.msra.mxu0 %v474_v33 }
  0x28   :  { %459 = vmatprep.subr.bf16.mxu0 %v482_v8 }
  0x2b   :  { %460 = vmatpush3.bf16.msra.mxu0 %v475_v34 }
  0x2c   :  { %461 = vmatprep.subr.bf16.mxu0 %v482_v8 }
  0x2f   :  { %462 = vmatpush3.bf16.msra.mxu0 %v476_v35 }
  0x32   :  { %464 = vmatmul.mubr.bf16.vlgmr.msra.gmra.mrb[0].mxu0 %v477_v36 }
 0x105   :  { %v323_v37 = vpop.f32.mrb[0].mxu0 }
 0x106   :  { %334 = vst [vmem:[%s579_s5] sm:$0xff] %v323_v37  ;;  %v465_v38 = vpop.f32.mrb[1].mxu0 }
 0x107   :  { %v326_v39 = vpop.f32.mrb[2].mxu0 }
 0x108   :  { %335 = vst [vmem:[%s579_s5 + $0x8] sm:$0xff] %v326_v39  ;;  %v466_v40 = vpop.f32.mrb[3].mxu0 }
 0x109   :  { %v384_v41 = vld [vmem:[%s577_s3] sm:$0x1]  ;;  %v386_v42 = vshrl.u32 %v39_v3, 7 }
 0x10b   :  { %vm387_vm3 = vcmp.lt.s32.totalorder %v386_v42, 1 }
 0x10c   :  { %v388_v43 = vsel %vm387_vm3, %v384_v41, %v20_v1 }
 0x10d   :  { %v392_v44 = vsel %vm84_vm1, %v388_v43, %v20_v1  ;;  %v349_v45 = vld [vmem:[%s579_s5] sm:$0xff] }
 0x10e   :  { %393 = vst [vmem:[#allocation20] sm:$0x1] %v392_v44 }
 0x10f   :  { %v350_v46 = vld [vmem:[%s579_s5 + $0x8] sm:$0xff] }
 0x115   :  { %v407_v47 = vld [vmem:[#allocation20] ss:$0 sm:$0xff] }
 0x116   :  { %v358_v48 = vadd.f32 %v407_v47, %v349_v45  ;;  %v359_v49 = vadd.f32 %v407_v47, %v350_v46 }
 0x118   :  { %v362_v50 = vmul.f32 %v358_v48, %v358_v48  ;;  %v363_v51 = vmul.f32 %v359_v49, %v359_v49  ;;  %v360_v60 = vmul.f32 0.5, %v358_v48  ;;  %v361_v62 = vmul.f32 0.5, %v359_v49 }
 0x11a   :  { %v364_v52 = vmul.f32 %v362_v50, %v358_v48  ;;  %v365_v53 = vmul.f32 %v363_v51, %v359_v49 }
 0x11c   :  { %v366_v54 = vmul.f32 0.044715, %v364_v52  ;;  %v367_v55 = vmul.f32 0.044715, %v365_v53 }
 0x11e   :  { %v368_v56 = vadd.f32 %v366_v54, %v358_v48  ;;  %v369_v57 = vadd.f32 %v367_v55, %v359_v49 }
 0x120   :  { %v370_v58 = vmul.f32 0.7978846, %v368_v56  ;;  %v371_v59 = vmul.f32 0.7978846, %v369_v57 }
 0x122   :  { %478 = vtanh.f32 %v370_v58 }
 0x123   :  { %480 = vtanh.f32 %v371_v59 }
 0x12c   :  { %v479_v61 = vpop.eup %478 }
 0x12d   :  { %v481_v63 = vpop.eup %480  ;;  %v374_v0 = vadd.f32 1.0, %v479_v61 }
 0x12e   :  { %v375_v1 = vadd.f32 1.0, %v481_v63 }
 0x12f   :  { %v376_v2 = vmul.f32 %v374_v0, %v360_v60 }
 0x130   :  { %v377_v3 = vmul.f32 %v375_v1, %v361_v62 }
 0x131   :  { %378 = vst [vmem:[%s579_s5] sm:$0xff] %v376_v2 }
 0x132   :  { %379 = vst [vmem:[%s579_s5 + $0x8] sm:$0xff] %v377_v3 }

</bundles_post_ra>
